<compile_context>
chip_gen: v7x
topology: tpu7x:2x2x1
jax: 0.10.0
libtpu: 0.0.40
codegen_flags: <defaults>
</compile_context>

<pallas_src>
import functools
import math

import jax
import jax.numpy as jnp
from jax import lax
from jax.experimental import pallas as pl
from jax.experimental.pallas import tpu as pltpu

_EPS = 1e-5
_HI = lax.Precision.HIGHEST
_NT = (((1,), (1,)), ((), ()))   # contract last dim of lhs with last dim of rhs (x @ W.T)
_NN = (((1,), (0,)), ((), ()))   # standard matmul


def _rmsnorm_f32(x, gain):
    """RMSNorm in f32, returns f32 (caller casts)."""
    xf = x.astype(jnp.float32)
    ms = jnp.mean(xf * xf, axis=-1, keepdims=True)
    return (xf * gain.astype(jnp.float32)) * lax.rsqrt(ms + _EPS)


# ------------- Kernel 1: ln1 + fused QKV projection + RoPE(q, k) ------------
def _qkv_rope_kernel(x_ref, g1_ref, wqkv_ref, cos_ref, sino_ref, sine_ref,
                     q_ref, k_ref, v_ref, *, q_scale):
    d_model = q_ref.shape[-1]
    x = x_ref[0]                                                  # (tS, D)
    h = _rmsnorm_f32(x, g1_ref[...]).astype(jnp.bfloat16)         # ln1 -> bf16 for MXU

    qkv = lax.dot_general(h, wqkv_ref[...], _NT,
                          preferred_element_type=jnp.float32)     # (tS, 3D) f32

    cos = cos_ref[...]
    sin_odd = sino_ref[...]       # sin at odd lanes, 0 at even lanes
    sin_even = sine_ref[...]      # sin at even lanes, 0 at odd lanes

    def rope(t):
        # Interleaved RoPE via two XLU lane rotations (no MXU work):
        #   out[2i]   = t[2i]*cos_i - t[2i+1]*sin_i
        #   out[2i+1] = t[2i+1]*cos_i + t[2i]*sin_i
        return (t * cos
                + pltpu.roll(t, shift=1, axis=1) * sin_odd
                - pltpu.roll(t, shift=d_model - 1, axis=1) * sin_even)

    q = qkv[:, :d_model]
    k = qkv[:, d_model:2 * d_model]
    v = qkv[:, 2 * d_model:]

    q_ref[0] = (rope(q) * q_scale).astype(q_ref.dtype)   # fold 1/sqrt(dh) into q
    k_ref[0] = rope(k).astype(k_ref.dtype)
    v_ref[0] = v.astype(v_ref.dtype)


# ---------------- Kernel 2: causal attention (all heads / q-tile) -----------
def _attention_kernel(q_ref, k_ref, v_ref, o_ref, *, num_heads):
    tq = q_ref.shape[1]
    s_len = k_ref.shape[1]
    d_model = q_ref.shape[2]
    dh = d_model // num_heads

    q = q_ref[0]                   # (tq, D) bf16, pre-scaled by 1/sqrt(dh)
    k = k_ref[0]                   # (S, D)  bf16
    v = v_ref[0]                   # (S, D)  bf16

    q_start = pl.program_id(1) * tq
    row = q_start + lax.broadcasted_iota(jnp.int32, (tq, s_len), 0)
    col = lax.broadcasted_iota(jnp.int32, (tq, s_len), 1)
    bias = jnp.where(row >= col, 0.0, -jnp.inf).astype(jnp.float32)

    outs = []
    for h in range(num_heads):
        sl = slice(h * dh, (h + 1) * dh)
        s = lax.dot_general(q[:, sl], k[:, sl], _NT,
                            preferred_element_type=jnp.float32) + bias
        m = jnp.max(s, axis=-1, keepdims=True)
        p = jnp.exp(s - m)
        l = jnp.sum(p, axis=-1, keepdims=True)
        o_h = lax.dot_general(p.astype(jnp.bfloat16), v[:, sl], _NN,
                              preferred_element_type=jnp.float32)
        # normalize after the PV matmul; EUP reciprocal in a free slot
        outs.append(o_h * pl.reciprocal(l, approx=True))

    o_ref[0] = jnp.concatenate(outs, axis=-1).astype(o_ref.dtype)


# ----- Kernel 3: out-proj + residual + ln2 + SwiGLU (F-tiled) + residual ----
def _proj_ffn_kernel(x_ref, a_ref, wo_ref, g2_ref, w1_ref, w3_ref, w2_ref,
                     o_ref, y_scr, h_scr, acc_scr):
    f = pl.program_id(2)

    @pl.when(f == 0)
    def _():
        attn = lax.dot_general(a_ref[0], wo_ref[...], _NT,
                               preferred_element_type=jnp.float32)
        y = x_ref[0].astype(jnp.float32) + attn                  # first residual
        y_scr[...] = y
        h_scr[...] = _rmsnorm_f32(y, g2_ref[...]).astype(jnp.bfloat16)
        acc_scr[...] = jnp.zeros_like(acc_scr)

    h = h_scr[...]                                               # (tS, D) bf16
    a1 = lax.dot_general(h, w1_ref[...], _NT,
                         preferred_element_type=jnp.float32)     # (tS, tF)
    a3 = lax.dot_general(h, w3_ref[...], _NT,
                         preferred_element_type=jnp.float32)
    gated = (a1 * (1.0 / (1.0 + jnp.exp(-a1)))) * a3             # silu(a1) * a3
    acc_scr[...] += lax.dot_general(gated.astype(jnp.bfloat16), w2_ref[...], _NT,
                                    preferred_element_type=jnp.float32)

    @pl.when(f == pl.num_programs(2) - 1)
    def _():
        o_ref[0] = (y_scr[...] + acc_scr[...]).astype(o_ref.dtype)


# ------------------------------- wrapper ------------------------------------
def _rope_tables(seq_len, d_head, num_heads, theta):
    pos = jnp.arange(seq_len, dtype=jnp.float32)[:, None]
    freqs = jnp.arange(0, d_head, 2, dtype=jnp.float32) / d_head
    angles = pos * (1.0 / (theta ** freqs))                      # (S, dh/2)
    cos = jnp.repeat(jnp.cos(angles), 2, axis=-1)                # (S, dh) interleaved
    sin = jnp.repeat(jnp.sin(angles), 2, axis=-1)
    parity = (jnp.arange(d_head) % 2).astype(jnp.float32)        # 0 even, 1 odd
    sin_odd = sin * parity
    sin_even = sin * (1.0 - parity)
    tile = lambda t: jnp.tile(t, (1, num_heads))                 # (S, D)
    return tile(cos), tile(sin_odd), tile(sin_even)


def _nbytes(shape, dtype):
    n = jnp.dtype(dtype).itemsize
    for d in shape:
        n *= d
    return n


def _compiler_params(sem, blocks):
    est = sum(_nbytes(s, d) for s, d in blocks)
    limit = int(min(max(4 * est, 16 * 2 ** 20), 100 * 2 ** 20))
    return pltpu.CompilerParams(dimension_semantics=sem, vmem_limit_bytes=limit)


def transformer_block(x, params, *, num_heads, theta=10000.0,
                      seq_block=None, q_block=None, ffn_block=None):
    B, S, D = x.shape
    H = num_heads
    dh = D // H
    assert D % H == 0 and dh % 2 == 0
    assert D % 128 == 0, "d_model must be lane-aligned (multiple of 128)"
    F = params["w1"].shape[0]

    tS = seq_block or min(S, 256)
    tQ = q_block or min(S, 256)
    tF = ffn_block or min(F, 512)
    assert S % tS == 0 and S % tQ == 0 and F % tF == 0
    assert tS % 8 == 0 and tQ % 8 == 0
    nS, nQ, nF = S // tS, S // tQ, F // tF

    bf16 = jnp.bfloat16
    wqkv = params["wqkv"].astype(bf16)              # (3D, D)
    wo = params["wo"].astype(bf16)                  # (D, D)
    w1 = params["w1"].astype(bf16)                  # (F, D)
    w2 = params["w2"].astype(bf16)                  # (D, F)
    w3 = params["w3"].astype(bf16)                  # (F, D)
    g1 = params["ln1"].reshape(1, D).astype(jnp.float32)
    g2 = params["ln2"].reshape(1, D).astype(jnp.float32)
    cos_t, sin_odd, sin_even = _rope_tables(S, dh, H, theta)

    # ---------------- Kernel 1: ln1 + QKV + RoPE ----------------
    x_spec = pl.BlockSpec((1, tS, D), lambda b, s: (b, s, 0))
    tbl_spec = pl.BlockSpec((tS, D), lambda b, s: (s, 0))
    qkv_blocks = [((1, tS, D), x.dtype), ((1, D), jnp.float32),
                  ((3 * D, D), bf16)] + [((tS, D), jnp.float32)] * 3 \
                 + [((1, tS, D), bf16)] * 3
    q, k, v = pl.pallas_call(
        functools.partial(_qkv_rope_kernel, q_scale=1.0 / math.sqrt(dh)),
        out_shape=tuple(jax.ShapeDtypeStruct((B, S, D), bf16) for _ in range(3)),
        grid=(B, nS),
        in_specs=[
            x_spec,
            pl.BlockSpec((1, D), lambda b, s: (0, 0)),        # ln1 gain
            pl.BlockSpec((3 * D, D), lambda b, s: (0, 0)),    # wqkv (resident)
            tbl_spec, tbl_spec, tbl_spec,                     # cos / sin_odd / sin_even
        ],
        out_specs=(x_spec, x_spec, x_spec),
        compiler_params=_compiler_params(("parallel", "parallel"), qkv_blocks),
    )(x, g1, wqkv, cos_t, sin_odd, sin_even)

    # ---------------- Kernel 2: causal attention ----------------
    q_spec = pl.BlockSpec((1, tQ, D), lambda b, qi: (b, qi, 0))
    kv_spec = pl.BlockSpec((1, S, D), lambda b, qi: (b, 0, 0))
    attn_blocks = [((1, tQ, D), bf16), ((1, S, D), bf16), ((1, S, D), bf16),
                   ((1, tQ, D), bf16), ((tQ, S), jnp.float32)]
    attn = pl.pallas_call(
        functools.partial(_attention_kernel, num_heads=H),
        out_shape=jax.ShapeDtypeStruct((B, S, D), bf16),
        grid=(B, nQ),
        in_specs=[q_spec, kv_spec, kv_spec],
        out_specs=q_spec,
        compiler_params=_compiler_params(("parallel", "parallel"), attn_blocks),
    )(q, k, v)

    # -------- Kernel 3: out-proj + residual + ln2 + SwiGLU + residual -------
    io_spec = pl.BlockSpec((1, tS, D), lambda b, s, f: (b, s, 0))
    ffn_blocks = [((1, tS, D), x.dtype), ((1, tS, D), bf16), ((D, D), bf16),
                  ((1, D), jnp.float32), ((tF, D), bf16), ((tF, D), bf16),
                  ((D, tF), bf16), ((1, tS, D), x.dtype),
                  ((tS, D), jnp.float32), ((tS, D), bf16), ((tS, D), jnp.float32)]
    out = pl.pallas_call(
        _proj_ffn_kernel,
        out_shape=jax.ShapeDtypeStruct((B, S, D), x.dtype),
        grid=(B, nS, nF),
        in_specs=[
            io_spec,                                            # x (residual)
            io_spec,                                            # attention heads (bf16)
            pl.BlockSpec((D, D), lambda b, s, f: (0, 0)),       # Wo (resident)
            pl.BlockSpec((1, D), lambda b, s, f: (0, 0)),       # ln2 gain
            pl.BlockSpec((tF, D), lambda b, s, f: (f, 0)),      # W1 tile
            pl.BlockSpec((tF, D), lambda b, s, f: (f, 0)),      # W3 tile
            pl.BlockSpec((D, tF), lambda b, s, f: (0, f)),      # W2 tile
        ],
        out_specs=io_spec,
        scratch_shapes=[pltpu.VMEM((tS, D), jnp.float32),       # y  (residual)
                        pltpu.VMEM((tS, D), jnp.bfloat16),      # ln2(y) for MXU
                        pltpu.VMEM((tS, D), jnp.float32)],      # FFN accumulator
        compiler_params=_compiler_params(
            ("parallel", "parallel", "arbitrary"), ffn_blocks),
    )(x, attn, wo, g2, w1, w3, w2)

    return out


# ---------------------------- init + reference ------------------------------
def init_block_params(key, d_model, num_heads, d_ff, dtype=jnp.float32):
    def trunc_linear(k, d_out, d_in):
        std = math.sqrt(2.0 / (d_out + d_in))
        w = jax.random.truncated_normal(k, -3.0, 3.0, (d_out, d_in), jnp.float32)
        return (w * std).astype(dtype)

    k1, k2, k3, k4, k5 = jax.random.split(key, 5)
    return {
        "ln1": jnp.ones((d_model,), dtype),
        "ln2": jnp.ones((d_model,), dtype),
        "wqkv": trunc_linear(k1, 3 * d_model, d_model),
        "wo": trunc_linear(k2, d_model, d_model),
        "w1": trunc_linear(k3, d_ff, d_model),
        "w2": trunc_linear(k4, d_model, d_ff),
        "w3": trunc_linear(k5, d_ff, d_model),
    }


def reference_block(x, params, *, num_heads, theta=10000.0):
    """Pure-JAX f32/HIGHEST mirror of the PyTorch Block.forward (swiglu)."""
    B, S, D = x.shape
    H = num_heads
    dh = D // H

    def rmsnorm(t, w):
        tf = t.astype(jnp.float32)
        rms = jnp.sqrt(jnp.mean(tf * tf, axis=-1, keepdims=True) + _EPS)
        return (tf * w / rms).astype(t.dtype)

    def linear(t, w):
        return jnp.einsum("oi,...i->...o", w, t, precision=_HI)

    h = rmsnorm(x, params["ln1"])
    qkv = linear(h, params["wqkv"])
    q, k, v = jnp.split(qkv, 3, axis=-1)

    def split_heads(t):
        return t.reshape(B, S, H, dh).transpose(0, 2, 1, 3)

    q, k, v = split_heads(q), split_heads(k), split_heads(v)

    pos = jnp.arange(S, dtype=jnp.float32)[:, None]
    freqs = jnp.arange(0, dh, 2, dtype=jnp.float32) / dh
    angles = pos * (1.0 / (theta ** freqs))
    cos, sin = jnp.cos(angles), jnp.sin(angles)

    def rope(t):
        te, to = t[..., 0::2], t[..., 1::2]
        re = te * cos - to * sin
        ro = te * sin + to * cos
        return jnp.stack([re, ro], axis=-1).reshape(t.shape)

    q, k = rope(q), rope(k)

    scores = jnp.einsum("bhqd,bhkd->bhqk", q, k, precision=_HI) / math.sqrt(dh)
    mask = jnp.tril(jnp.ones((S, S), dtype=bool))
    scores = jnp.where(mask, scores, -jnp.inf)
    m = jnp.max(scores, axis=-1, keepdims=True)
    p = jnp.exp(scores - m)
    w = p / jnp.sum(p, axis=-1, keepdims=True)
    y = jnp.einsum("bhqk,bhkd->bhqd", w, v, precision=_HI)
    y = y.transpose(0, 2, 1, 3).reshape(B, S, D)
    x = x + linear(y, params["wo"])

    h2 = rmsnorm(x, params["ln2"])
    a1 = linear(h2, params["w1"])
    a3 = linear(h2, params["w3"])
    gated = a1 * jax.nn.sigmoid(a1) * a3
    return x + linear(gated, params["w2"])


if __name__ == "__main__":
    key = jax.random.PRNGKey(0)
    pkey, xkey = jax.random.split(key)

    # Small, TPU-friendly shapes (lane-aligned d_model).
    batch, seq, d_model, num_heads, d_ff = 2, 64, 128, 4, 256

    params = init_block_params(pkey, d_model, num_heads, d_ff)
    x = jax.random.normal(xkey, (batch, seq, d_model), dtype=jnp.float32)

    out = transformer_block(x, params, num_heads=num_heads,
                            seq_block=32, q_block=32, ffn_block=128)
    out = jax.block_until_ready(out)

    ref = reference_block(x, params, num_heads=num_heads)
    assert out.shape == x.shape and out.dtype == x.dtype

    # The kernel runs MXU matmuls in bf16 (f32 accumulate) per the performance
    # review; compare against the f32/HIGHEST reference with a mixed-precision
    # tolerance (relative L2).
    err = out.astype(jnp.float32) - ref.astype(jnp.float32)
    rel_l2 = float(jnp.linalg.norm(err) / jnp.linalg.norm(ref.astype(jnp.float32)))
    max_abs = float(jnp.max(jnp.abs(err)))
    assert rel_l2 < 2.5e-2, f"relative L2 error {rel_l2} (max abs {max_abs})"
    print("KERNEL_OK")
</pallas_src>

<mosaic_0001>
module attributes {stable_mosaic.version = 11 : i64} {
  func.func @_qkv_rope_kernel(%arg0: i32, %arg1: i32, %arg2: memref<1x32x128xf32, #tpu.memory_space<vmem>>, %arg3: memref<1x128xf32, #tpu.memory_space<vmem>>, %arg4: memref<384x128xbf16, #tpu.memory_space<vmem>>, %arg5: memref<32x128xf32, #tpu.memory_space<vmem>>, %arg6: memref<32x128xf32, #tpu.memory_space<vmem>>, %arg7: memref<32x128xf32, #tpu.memory_space<vmem>>, %arg8: memref<1x32x128xbf16, #tpu.memory_space<vmem>>, %arg9: memref<1x32x128xbf16, #tpu.memory_space<vmem>>, %arg10: memref<1x32x128xbf16, #tpu.memory_space<vmem>>) attributes {dimension_semantics = [#tpu.dimension_semantics<parallel>, #tpu.dimension_semantics<parallel>], iteration_bounds = array<i64: 2, 2>, scalar_prefetch = 0 : i64, scratch_operands = 0 : i64, tpu.core_type = #tpu.core_type<tc>, window_params = [{transform_indices = @transform_0, window_bounds = array<i64: 1, 32, 128>}, {pipeline_mode = #tpu.pipeline_mode<synchronous>, transform_indices = @transform_1, window_bounds = array<i64: 1, 128>}, {pipeline_mode = #tpu.pipeline_mode<synchronous>, transform_indices = @transform_2, window_bounds = array<i64: 384, 128>}, {transform_indices = @transform_3, window_bounds = array<i64: 32, 128>}, {transform_indices = @transform_4, window_bounds = array<i64: 32, 128>}, {transform_indices = @transform_5, window_bounds = array<i64: 32, 128>}, {transform_indices = @transform_6, window_bounds = array<i64: 1, 32, 128>}, {transform_indices = @transform_7, window_bounds = array<i64: 1, 32, 128>}, {transform_indices = @transform_8, window_bounds = array<i64: 1, 32, 128>}]} {
    %c0 = arith.constant 0 : index
    %c0_0 = arith.constant 0 : index
    %c0_1 = arith.constant 0 : index
    %0 = vector.load %arg2[%c0, %c0_0, %c0_1] : memref<1x32x128xf32, #tpu.memory_space<vmem>>, vector<1x32x128xf32>
    %1 = vector.shape_cast %0 : vector<1x32x128xf32> to vector<32x128xf32>
    %c0_2 = arith.constant 0 : index
    %c0_3 = arith.constant 0 : index
    %2 = vector.load %arg3[%c0_2, %c0_3] : memref<1x128xf32, #tpu.memory_space<vmem>>, vector<1x128xf32>
    %3 = arith.mulf %1, %1 : vector<32x128xf32>
    %cst = arith.constant dense<0.000000e+00> : vector<32xf32>
    %4 = vector.multi_reduction <add>, %3, %cst [1] : vector<32x128xf32> to vector<32xf32>
    %5 = vector.shape_cast %4 : vector<32xf32> to vector<32x1xf32>
    %cst_4 = arith.constant 1.280000e+02 : f32
    %6 = vector.broadcast %cst_4 : f32 to vector<32x1xf32>
    %7 = arith.divf %5, %6 : vector<32x1xf32>
    %8 = vector.broadcast %2 : vector<1x128xf32> to vector<32x128xf32>
    %9 = arith.mulf %1, %8 : vector<32x128xf32>
    %cst_5 = arith.constant 9.99999974E-6 : f32
    %10 = vector.broadcast %cst_5 : f32 to vector<32x1xf32>
    %11 = arith.addf %7, %10 : vector<32x1xf32>
    %12 = math.rsqrt %11 : vector<32x1xf32>
    %13 = vector.broadcast %12 : vector<32x1xf32> to vector<32x128xf32>
    %14 = arith.mulf %9, %13 : vector<32x128xf32>
    %15 = arith.truncf %14 : vector<32x128xf32> to vector<32x128xbf16>
    %c0_6 = arith.constant 0 : index
    %c0_7 = arith.constant 0 : index
    %16 = vector.load %arg4[%c0_6, %c0_7] : memref<384x128xbf16, #tpu.memory_space<vmem>>, vector<384x128xbf16>
    %cst_8 = arith.constant dense<0.000000e+00> : vector<32x384xf32>
    %17 = tpu.matmul %15, %16, %cst_8 {dimension_numbers = #tpu.dot_dimension_numbers<[1], [1], [0], [0], [0, 0, 1, 0], [], []>} : vector<32x128xbf16>, vector<384x128xbf16>, vector<32x384xf32> -> vector<32x384xf32>
    %c0_9 = arith.constant 0 : index
    %c0_10 = arith.constant 0 : index
    %18 = vector.load %arg5[%c0_9, %c0_10] : memref<32x128xf32, #tpu.memory_space<vmem>>, vector<32x128xf32>
    %c0_11 = arith.constant 0 : index
    %c0_12 = arith.constant 0 : index
    %19 = vector.load %arg6[%c0_11, %c0_12] : memref<32x128xf32, #tpu.memory_space<vmem>>, vector<32x128xf32>
    %c0_13 = arith.constant 0 : index
    %c0_14 = arith.constant 0 : index
    %20 = vector.load %arg7[%c0_13, %c0_14] : memref<32x128xf32, #tpu.memory_space<vmem>>, vector<32x128xf32>
    %21 = vector.extract_strided_slice %17 {offsets = [0, 0], sizes = [32, 128], strides = [1, 1]} : vector<32x384xf32> to vector<32x128xf32>
    %22 = vector.extract_strided_slice %17 {offsets = [0, 128], sizes = [32, 128], strides = [1, 1]} : vector<32x384xf32> to vector<32x128xf32>
    %23 = vector.extract_strided_slice %17 {offsets = [0, 256], sizes = [32, 128], strides = [1, 1]} : vector<32x384xf32> to vector<32x128xf32>
    %24 = arith.mulf %21, %18 : vector<32x128xf32>
    %c1_i32 = arith.constant 1 : i32
    %25 = tpu.dynamic_rotate %21 by %c1_i32 dim 1 : vector<32x128xf32>, i32 -> vector<32x128xf32>
    %26 = arith.mulf %25, %19 : vector<32x128xf32>
    %27 = arith.addf %24, %26 : vector<32x128xf32>
    %c127_i32 = arith.constant 127 : i32
    %28 = tpu.dynamic_rotate %21 by %c127_i32 dim 1 : vector<32x128xf32>, i32 -> vector<32x128xf32>
    %29 = arith.mulf %28, %20 : vector<32x128xf32>
    %30 = arith.subf %27, %29 : vector<32x128xf32>
    %cst_15 = arith.constant 0.176776692 : f32
    %31 = vector.broadcast %cst_15 : f32 to vector<32x128xf32>
    %32 = arith.mulf %30, %31 : vector<32x128xf32>
    %33 = arith.truncf %32 : vector<32x128xf32> to vector<32x128xbf16>
    %c0_16 = arith.constant 0 : index
    %c0_17 = arith.constant 0 : index
    %c0_18 = arith.constant 0 : index
    %34 = vector.load %arg8[%c0_16, %c0_17, %c0_18] : memref<1x32x128xbf16, #tpu.memory_space<vmem>>, vector<1x32x128xbf16>
    %35 = vector.shape_cast %34 : vector<1x32x128xbf16> to vector<32x128xbf16>
    %36 = vector.shape_cast %33 : vector<32x128xbf16> to vector<1x32x128xbf16>
    tpu.vector_store %arg8[%c0_16, %c0_17, %c0_18], %36 {strides = array<i32>} : memref<1x32x128xbf16, #tpu.memory_space<vmem>>, vector<1x32x128xbf16>,
    %37 = arith.mulf %22, %18 : vector<32x128xf32>
    %c1_i32_19 = arith.constant 1 : i32
    %38 = tpu.dynamic_rotate %22 by %c1_i32_19 dim 1 : vector<32x128xf32>, i32 -> vector<32x128xf32>
    %39 = arith.mulf %38, %19 : vector<32x128xf32>
    %40 = arith.addf %37, %39 : vector<32x128xf32>
    %c127_i32_20 = arith.constant 127 : i32
    %41 = tpu.dynamic_rotate %22 by %c127_i32_20 dim 1 : vector<32x128xf32>, i32 -> vector<32x128xf32>
    %42 = arith.mulf %41, %20 : vector<32x128xf32>
    %43 = arith.subf %40, %42 : vector<32x128xf32>
    %44 = arith.truncf %43 : vector<32x128xf32> to vector<32x128xbf16>
    %c0_21 = arith.constant 0 : index
    %c0_22 = arith.constant 0 : index
    %c0_23 = arith.constant 0 : index
    %45 = vector.load %arg9[%c0_21, %c0_22, %c0_23] : memref<1x32x128xbf16, #tpu.memory_space<vmem>>, vector<1x32x128xbf16>
    %46 = vector.shape_cast %45 : vector<1x32x128xbf16> to vector<32x128xbf16>
    %47 = vector.shape_cast %44 : vector<32x128xbf16> to vector<1x32x128xbf16>
    tpu.vector_store %arg9[%c0_21, %c0_22, %c0_23], %47 {strides = array<i32>} : memref<1x32x128xbf16, #tpu.memory_space<vmem>>, vector<1x32x128xbf16>,
    %48 = arith.truncf %23 : vector<32x128xf32> to vector<32x128xbf16>
    %c0_24 = arith.constant 0 : index
    %c0_25 = arith.constant 0 : index
    %c0_26 = arith.constant 0 : index
    %49 = vector.load %arg10[%c0_24, %c0_25, %c0_26] : memref<1x32x128xbf16, #tpu.memory_space<vmem>>, vector<1x32x128xbf16>
    %50 = vector.shape_cast %49 : vector<1x32x128xbf16> to vector<32x128xbf16>
    %51 = vector.shape_cast %48 : vector<32x128xbf16> to vector<1x32x128xbf16>
    tpu.vector_store %arg10[%c0_24, %c0_25, %c0_26], %51 {strides = array<i32>} : memref<1x32x128xbf16, #tpu.memory_space<vmem>>, vector<1x32x128xbf16>,
    return
  }
  func.func @transform_0(%arg0: i32, %arg1: i32) -> (i32, i32, i32) {
    %c0_i32 = arith.constant 0 : i32
    %c0_i32_0 = arith.constant 0 : i32
    return %arg0, %arg1, %c0_i32 : i32, i32, i32
  }
  func.func @transform_1(%arg0: i32, %arg1: i32) -> (i32, i32) {
    %c0_i32 = arith.constant 0 : i32
    %c0_i32_0 = arith.constant 0 : i32
    %c0_i32_1 = arith.constant 0 : i32
    return %c0_i32, %c0_i32_0 : i32, i32
  }
  func.func @transform_2(%arg0: i32, %arg1: i32) -> (i32, i32) {
    %c0_i32 = arith.constant 0 : i32
    %c0_i32_0 = arith.constant 0 : i32
    %c0_i32_1 = arith.constant 0 : i32
    return %c0_i32, %c0_i32_0 : i32, i32
  }
  func.func @transform_3(%arg0: i32, %arg1: i32) -> (i32, i32) {
    %c0_i32 = arith.constant 0 : i32
    %c0_i32_0 = arith.constant 0 : i32
    return %arg1, %c0_i32 : i32, i32
  }
  func.func @transform_4(%arg0: i32, %arg1: i32) -> (i32, i32) {
    %c0_i32 = arith.constant 0 : i32
    %c0_i32_0 = arith.constant 0 : i32
    return %arg1, %c0_i32 : i32, i32
  }
  func.func @transform_5(%arg0: i32, %arg1: i32) -> (i32, i32) {
    %c0_i32 = arith.constant 0 : i32
    %c0_i32_0 = arith.constant 0 : i32
    return %arg1, %c0_i32 : i32, i32
  }
  func.func @transform_6(%arg0: i32, %arg1: i32) -> (i32, i32, i32) {
    %c0_i32 = arith.constant 0 : i32
    %c0_i32_0 = arith.constant 0 : i32
    return %arg0, %arg1, %c0_i32 : i32, i32, i32
  }
  func.func @transform_7(%arg0: i32, %arg1: i32) -> (i32, i32, i32) {
    %c0_i32 = arith.constant 0 : i32
    %c0_i32_0 = arith.constant 0 : i32
    return %arg0, %arg1, %c0_i32 : i32, i32, i32
  }
  func.func @transform_8(%arg0: i32, %arg1: i32) -> (i32, i32, i32) {
    %c0_i32 = arith.constant 0 : i32
    %c0_i32_0 = arith.constant 0 : i32
    return %arg0, %arg1, %c0_i32 : i32, i32, i32
  }
}

</mosaic_0001>

<bundles_post_ra>
// kernel: tpu_custom_call.1
= control target key start
LH: loop header
LB: loop body
LE: loop exit
PB: predicated region body
PF: predicated region fallthrough
CT: control target
= control target key end

     0   :  { %s2636_s0 = inlined_call_operand.hbm [shape: f32[2,64,128], index: 0, kind: input, shape index: {}]   ;;  %s2637_s1 = inlined_call_operand.vmem [shape: f32[1,128], index: 1, kind: input, shape index: {}]   ;;  %s2638_s2 = inlined_call_operand.hbm [shape: bf16[384,128], index: 2, kind: input, shape index: {}]   ;;  %s2639_s3 = inlined_call_operand.hbm [shape: f32[64,128], index: 3, kind: input, shape index: {}]   ;;  %s2640_s4 = inlined_call_operand.hbm [shape: f32[64,128], index: 4, kind: input, shape index: {}]   ;;  %s2641_s5 = inlined_call_operand.hbm [shape: f32[64,128], index: 5, kind: input, shape index: {}]   ;;  %s2642_s6 = inlined_call_operand.hbm [shape: bf16[2,64,128], index: 6, kind: output, shape index: {0}]   ;;  %s2643_s7 = inlined_call_operand.hbm [shape: bf16[2,64,128], index: 7, kind: output, shape index: {1}]   ;;  %s2644_s8 = inlined_call_operand.hbm [shape: bf16[2,64,128], index: 8, kind: output, shape index: {2}]  }
   0x1   :  { %2669 = sst [smem:[#allocation28_spill]] %s2636_s0 }
   0x2   :  { %2670 = sst [smem:[#allocation29_spill]] %s2637_s1 }
   0x3   :  { %2671 = sst [smem:[#allocation30_spill]] %s2638_s2 }
   0x4   :  { %2672 = sst [smem:[#allocation31_spill]] %s2639_s3 }
   0x5   :  { %2673 = sst [smem:[#allocation32_spill]] %s2640_s4 }
   0x6   :  { %2674 = sst [smem:[#allocation33_spill]] %s2641_s5 }
   0x7   :  { %2675 = sst [smem:[#allocation34_spill]] %s2642_s6 }
   0x8   :  { %2676 = sst [smem:[#allocation35_spill]] %s2643_s7 }
   0x9   :  { %2677 = sst [smem:[#allocation36_spill]] %s2644_s8 }
   0xa   :  { %14 = vsyncpa [#allocation3], 0 }
   0xb   :  { %16 = vsyncpa [#allocation3 + $0x1], 0 }
   0xc   :  { %17 = vsyncpa [#allocation6], 0 }
   0xd   :  { %18 = vsyncpa [#allocation4], 0 }
   0xe   :  { %20 = vsyncpa [#allocation4 + $0x1], 0 }
   0xf   :  { %21 = vsyncpa [#allocation12], 0 }
  0x10   :  { %23 = vsyncpa [#allocation12 + $0x1], 0  ;;  %s2030_s27 = smov 0   ;;  %s2032_s28 = smov 0  }
  0x11   :  { %s2034_s29 = smov 0   ;;  %s2036_s30 = smov 0  }
  0x12   :  { %s2038_s9 = smov 0   ;;  %s2040_s10 = smov 0  }
  0x13   :  { %s2042_s11 = smov 0   ;;  %s2044_s12 = smov 0  }
  0x14   :  { %s2046_s13 = smov 0   ;;  %s2048_s14 = smov 0  }
  0x15   :  { %s2050_s15 = smov 0  }
  0x16 LB: > { %2678 = sst [smem:[#allocation19_spill]] %s1947_s10  ;;  %s38_s16 = sadd.s32 1, %s1959_s13  ;;  %s1967_s15 = sphi %s2050_s15, %s29_s15   ;;  %s1963_s14 = sphi %s2048_s14, %s2730_s14   ;;  %s1959_s13 = sphi %s2046_s13, %s2729_s13   ;;  %s1955_s12 = sphi %s2044_s12, %s2728_s12   ;;  %s1951_s11 = sphi %s2042_s11, %s2736_s11   ;;  %s1947_s10 = sphi %s2040_s10, %s2726_s10   ;;  %s1943_s9 = sphi %s2038_s9, %s2735_s9   ;;  %s1939_s30 = sphi %s2036_s30, %s2734_s30   ;;  %s1935_s29 = sphi %s2034_s29, %s2733_s29   ;;  %s1931_s28 = sphi %s2032_s28, %s2732_s28   ;;  %s1927_s27 = sphi %s2030_s27, %s2731_s27  }
  0x17   : > { %2679 = sst [smem:[#allocation20_spill]] %s1951_s11  ;;  %s41_s17 = sadd.s32 1, %s1963_s14 }
  0x18   : > { %2680 = sst [smem:[#allocation21_spill]] %s1955_s12  ;;  %p39_p0 = scmp.ge.s32.totalorder %s38_s16, 2 }
  0x19   : > { %2681 = sst [smem:[#allocation22_spill]] %s1959_s13  ;;  %s50_s18 = sadd.s32 1, %s1947_s10 }
  0x1a   : > { %2682 = sst [smem:[#allocation23_spill]] %s1963_s14  ;;  %p2651_p1 = scmp.ne.s32.totalorder %s1947_s10, %s1943_s9 }
  0x1b   : > { %p2653_p2 = scmp.eq.s32.totalorder %s1967_s15, 0  ;;  %s2738_s16 = smov (%p39_p0, %s38_s16), 0 }
  0x1c   : > { %2683 = sst [smem:[#allocation24_spill]] %s2738_s16  ;;  %s2740_s17 = smov (!%p39_p0, %s41_s17), %s1963_s14 }
  0x1d   : > { %s2096_s19 = ssub.s32 %s1959_s13, %s2738_s16  ;;  %p2103_p3 = por %p2653_p2, %p2651_p1 }
  0x1e   : > { %p43_p4 = scmp.ge.s32.totalorder %s2740_s17, 2  ;;  %p116_p5 = scmp.eq.s32.totalorder %s2096_s19, 0 }
  0x1f   : > { %p2652_p6 = scmp.lt.s32.totalorder %s1967_s15, 4  ;;  %s307_s21 = sand.u32 1, %s1967_s15  }
  0x20   : > { %s2742_s17 = smov (%p43_p4, %s2740_s17), 0  ;;  %s309_s22 = sand.u32 1, %s1947_s10  }
  0x21   : > { %2685 = sst [smem:[#allocation25_spill]] %s2742_s17  ;;  %s45_s23 = ssub.s32 %s1963_s14, %s2742_s17 }
  0x22   : > { %s47_s24 = sor.u32 %s2096_s19, %s45_s23  ;;  %s1280_s25 = sshll.u32 %s309_s22, 5 }
  0x23   : > { %p48_p7 = scmp.eq.s32.totalorder %s47_s24, 0  ;;  %s1281_s26 = sshll.u32 %s1959_s13, 2 }
  0x24   : > { %s1282_s16 = sshll.u32 %s1963_s14, 3  ;;  %s311_s6 = scalar_lea.vmem [#allocation2], %s1280_s25 }
  0x25   : > { %s2119_s8 = scalar_select %p48_p7, %s1947_s10, %s50_s18  }
  0x26   : > { %s317_s7 = sadd.s32 %s1282_s16, %s1281_s26  ;;  %s320_s12 = sshll.u32 %s311_s6, 4  ;;  %s2121_s12 = int_to_ptr.vmem [resolvable:$true] %s320_s12 }
  0x27   : > { %2686 = sst [smem:[#allocation26_spill]] %s2119_s8  ;;  %s1283_s11 = sshll.u32 %s317_s7, 7 }
  0x28   : > { %s2687_s0 = sld [smem:[#allocation28_spill]]  ;;  %p2132_p8 = pnand %p2652_p6, %p2103_p3 }
  0x29   : > { %s2136_s6 = scalar_lea.sflag [#allocation3], %s307_s21 }
  0x2a   : > { %p1631_p10 = pneg %p2132_p8 }
  0x2e   : > { %s2126_s5 = scalar_lea.hbm %s2687_s0, %s1283_s11  ;;  %s1634_s11 = scalar_lea.hbm %s2687_s0, 2048 }
  0x2f   : > { %s1629_s7 = scalar_lea.hbm %s2126_s5, 512  ;;  %p1635_p13 = scmp.lt.u32.totalorder %s2126_s5, %s2687_s0 }
  0x30   : > { %p1630_p9 = scmp.ne.s32.totalorder %s2126_s5, %s1629_s7  ;;  %p1636_p0 = scmp.lt.u32.totalorder %s1634_s11, %s1629_s7 }
  0x31   : > { %p1638_p4 = scmp.lt.u32.totalorder %s1629_s7, %s2126_s5 }
  0x32   : > { %p1632_p11 = pnand %p1631_p10, %p1630_p9  ;;  %p1637_p3 = por %p1636_p0, %p1635_p13 }
  0x34   : > { %p1633_p12 = pneg %p1632_p11  ;;  %p1639_p7 = por %p1638_p4, %p1637_p3 }
  0x36   : > { %p1640_p1 = pnand %p1639_p7, %p1633_p12 }
  0x38   : > { %1643 = shalt.err (!%p1640_p1)
}
  0x39   : > { %s1644_s21 = scalar_lea.vmem %s2121_s12, 512  ;;  %s1969_s22 = smov [#allocation2]  }
  0x3a   : > { %p1645_p9 = scmp.ne.s32.totalorder %s2121_s12, %s1644_s21  ;;  %s1649_s23 = sshll.u32 %s1969_s22, 4  ;;  %s1650_s23 = int_to_ptr.vmem [resolvable:$false] %s1649_s23 }
  0x3b   : > { %s1651_s24 = scalar_lea.vmem %s1650_s23, 1024  ;;  %p1652_p2 = scmp.lt.s32.totalorder %s2121_s12, %s1650_s23 }
  0x3c   : > { %p1647_p11 = pnand %p1645_p9, %p1631_p10  ;;  %p1653_p13 = scmp.lt.s32.totalorder %s1651_s24, %s1644_s21 }
  0x3e   : > { %p1648_p6 = pneg %p1647_p11  ;;  %p1654_p0 = por %p1653_p13, %p1652_p2 }
  0x40   : > { %p1655_p3 = pnand %p1654_p0, %p1648_p6 }
  0x42   : > { %1658 = shalt.err (!%p1655_p3)
}
  0x43   : > { %s2656_s25 = smov 128   ;;  %s2657_s26 = smov 8  }
  0x44   : > { %1476 = dma.hbm_to_vmem [thread:$0]  (!%p2132_p8), %s2126_s5, 512, %s2121_s12, %s2136_s6, %s2656_s25, %s2656_s25, %s2657_s26  }
  0x45   : > { %s2168_s7 = sshll.u32 %s1959_s13, 9  ;;  %s118_s1 = sadd.s32 1, %s1935_s29 }
  0x46   : > { %p125_p1 = scmp.ne.s32.totalorder %s1935_s29, %s1931_s28  ;;  %p2690_p2 = scmp.eq.s32.totalorder %s1967_s15, 0 }
  0x47   : > { %s2176_s2 = scalar_select %p116_p5, %s1935_s29, %s118_s1  }
  0x48   : > { %p127_p6 = por %p125_p1, %p2690_p2  ;;  %s332_s11 = sand.u32 1, %s1935_s29  }
  0x49   : > { %2689 = sst [smem:[#allocation27_spill]] %s2176_s2  ;;  %s2181_s16 = sshll.u32 %s332_s11, 5 }
  0x4a   : > { %s2691_s3 = sld [smem:[#allocation31_spill]]  ;;  %p2692_p8 = scmp.lt.s32.totalorder %s1967_s15, 4 }
  0x4b   : > { %s334_s12 = scalar_lea.vmem [#allocation7], %s2181_s16 }
  0x4c   : > { %p2191_p10 = pnand %p2692_p8, %p127_p6  ;;  %s341_s19 = sshll.u32 %s334_s12, 4  ;;  %s2196_s19 = int_to_ptr.vmem [resolvable:$true] %s341_s19 }
  0x4e   : > { %s2693_s5 = scalar_select %p2191_p10, 1, 0 }
  0x4f   : > { %p2202_p12 = pneg %p2191_p10 }
  0x50   : > { %s2187_s18 = scalar_lea.hbm %s2691_s3, %s2168_s7  ;;  %s1664_s11 = scalar_lea.hbm %s2691_s3, 1024 }
  0x51   : > { %s1659_s22 = scalar_lea.hbm %s2187_s18, 512  ;;  %p1665_p9 = scmp.lt.u32.totalorder %s2187_s18, %s2691_s3 }
  0x52   : > { %p1660_p5 = scmp.ne.s32.totalorder %s2187_s18, %s1659_s22  ;;  %p1666_p11 = scmp.lt.u32.totalorder %s1664_s11, %s1659_s22 }
  0x53   : > { %s2694_s23 = scalar_select %p2202_p12, 1, 0 }
  0x54   : > { %p1662_p4 = pnand %p2202_p12, %p1660_p5  ;;  %p1667_p13 = por %p1666_p11, %p1665_p9 }
  0x55   : > { %p1668_p0 = scmp.lt.u32.totalorder %s1659_s22, %s2187_s18 }
  0x56   : > { %p1663_p7 = pneg %p1662_p4 }
  0x57   : > { %p1669_p3 = por %p1668_p0, %p1667_p13 }
  0x59   : > { %p1670_p1 = pnand %p1669_p3, %p1663_p7 }
  0x5b   : > { %1673 = shalt.err (!%p1670_p1)
}
  0x5c   : > { %s1674_s12 = scalar_lea.vmem %s2196_s19, 512  ;;  %s1972_s24 = smov [#allocation7]  }
  0x5d   : > { %p1675_p2 = scmp.ne.s32.totalorder %s2196_s19, %s1674_s12  ;;  %s1679_s1 = sshll.u32 %s1972_s24, 4  ;;  %s1680_s1 = int_to_ptr.vmem [resolvable:$false] %s1679_s1 }
  0x5e   : > { %s1681_s20 = scalar_lea.vmem %s1680_s1, 1024  ;;  %p1682_p5 = scmp.lt.s32.totalorder %s2196_s19, %s1680_s1 }
  0x5f   : > { %p1677_p6 = pnand %p1675_p2, %p2202_p12  ;;  %p1683_p4 = scmp.lt.s32.totalorder %s1681_s20, %s1674_s12 }
  0x61   : > { %p1678_p8 = pneg %p1677_p6  ;;  %p1684_p9 = por %p1683_p4, %p1682_p5 }
  0x63   : > { %p1685_p11 = pnand %p1684_p9, %p1678_p8 }
  0x65   : > { %1688 = shalt.err (!%p1685_p11)
}
  0x66   : > { %1479 = dma.hbm_to_vmem [thread:$0]  (!%p2191_p10), %s2187_s18, 512, %s2196_s19, %s2136_s6, %s2656_s25, %s2656_s25, %s2657_s26  }
  0x67   : > { %s2695_s4 = sld [smem:[#allocation32_spill]]  ;;  %s355_s12 = scalar_lea.vmem [#allocation8], %s2181_s16 }
  0x68   : > { %s362_s24 = sshll.u32 %s355_s12, 4  ;;  %s2236_s24 = int_to_ptr.vmem [resolvable:$true] %s362_s24 }
  0x6d   : > { %s2233_s21 = scalar_lea.hbm %s2695_s4, %s2168_s7  ;;  %s1694_s19 = scalar_lea.hbm %s2695_s4, 1024 }
  0x6e   : > { %s1689_s1 = scalar_lea.hbm %s2233_s21, 512  ;;  %p1695_p3 = scmp.lt.u32.totalorder %s2233_s21, %s2695_s4 }
  0x6f   : > { %p1690_p7 = scmp.ne.s32.totalorder %s2233_s21, %s1689_s1  ;;  %p1696_p1 = scmp.lt.u32.totalorder %s1694_s19, %s1689_s1 }
  0x70   : > { %p1698_p6 = scmp.lt.u32.totalorder %s1689_s1, %s2233_s21 }
  0x71   : > { %p1692_p13 = pnand %p1690_p7, %p2202_p12  ;;  %p1697_p2 = por %p1696_p1, %p1695_p3 }
  0x73   : > { %p1693_p0 = pneg %p1692_p13  ;;  %p1699_p8 = por %p1698_p6, %p1697_p2 }
  0x75   : > { %p1700_p5 = pnand %p1699_p8, %p1693_p0 }
  0x77   : > { %1703 = shalt.err (!%p1700_p5)
}
  0x78   : > { %s1704_s12 = scalar_lea.vmem %s2236_s24, 512  ;;  %s1973_s20 = smov [#allocation8]  }
  0x79   : > { %p1705_p4 = scmp.ne.s32.totalorder %s2236_s24, %s1704_s12  ;;  %s1709_s18 = sshll.u32 %s1973_s20, 4  ;;  %s1710_s18 = int_to_ptr.vmem [resolvable:$false] %s1709_s18 }
  0x7a   : > { %s1711_s22 = scalar_lea.vmem %s1710_s18, 1024  ;;  %p1712_p7 = scmp.lt.s32.totalorder %s2236_s24, %s1710_s18 }
  0x7b   : > { %p1707_p9 = pnand %p1705_p4, %p2202_p12  ;;  %p1713_p13 = scmp.lt.s32.totalorder %s1711_s22, %s1704_s12 }
  0x7d   : > { %p1708_p11 = pneg %p1707_p9  ;;  %p1714_p3 = por %p1713_p13, %p1712_p7 }
  0x7f   : > { %p1715_p1 = pnand %p1714_p3, %p1708_p11 }
  0x81   : > { %1718 = shalt.err (!%p1715_p1)
}
  0x82   : > { %1482 = dma.hbm_to_vmem [thread:$0]  (!%p2191_p10), %s2233_s21, 512, %s2236_s24, %s2136_s6, %s2656_s25, %s2656_s25, %s2657_s26  }
  0x83   : > { %s2264_s1 = sadd.s32 4294967295, %s1967_s15   ;;  %s2655_s19 = sadd.s32 4294967294, %s1967_s15  }
  0x84   : > { %p63_p0 = scmp.ne.s32.totalorder %s1943_s9, %s1939_s30  ;;  %p2662_p2 = scmp.eq.s32.totalorder %s2264_s1, 0 }
  0x85   : > { %p131_p6 = scmp.ne.s32.totalorder %s1931_s28, %s1927_s27  ;;  %p209_p8 = scmp.eq.s32.totalorder %s2264_s1, 3 }
  0x86   : > { %p215_p5 = scmp.eq.s32.totalorder %s2655_s19, 3  ;;  %p2277_p4 = por %p2662_p2, %p63_p0 }
  0x87   : > { %p2283_p9 = por %p131_p6, %p2662_p2  ;;  %p2698_p11 = scmp.ne.s32.totalorder %s1947_s10, %s1943_s9 }
  0x88   : > { %s2696_s11 = scalar_select %p2277_p4, 1, 0 }
  0x89   : > { %s2697_s21 = scalar_select %p2283_p9, 1, 0 }
  0x8a   : > { %p2290_p7 = por %p209_p8, %p2698_p11  ;;  %p2294_p13 = por %p215_p5, %p63_p0 }
  0x8b   : > { %p1277_p3 = scmp.ge.s32.totalorder %s1967_s15, 1  ;;  %p278_p1 = scmp.lt.s32.totalorder %s1967_s15, 5 }
  0x8c   : > { %s2699_s24 = scalar_select %p2290_p7, 1, 0 }
  0x8d   : > { %s2700_s27 = scalar_select %p2294_p13, 1, 0 }
  0x8e   : > { %p2300_p10 = pnand %p1277_p3, %p278_p1  ;;  %s1974_s20 = smov [#allocation5]  }
  0x8f   : > { %s293_s18 = sshll.u32 %s1974_s20, 4  ;;  %s376_s19 = scalar_lea.vmem [#allocation9], %s2181_s16  ;;  %s2304_s18 = int_to_ptr.vmem [resolvable:$true] %s293_s18 }
  0x90   : > { %s2701_s12 = scalar_select %p2300_p10, 1, 0 }
  0x91   : > { %p1469_p6 = pneg %p2300_p10  ;;  %s383_s25 = sshll.u32 %s376_s19, 4  ;;  %s2321_s25 = int_to_ptr.vmem [resolvable:$true] %s383_s25 }
  0x92   : > { %s2703_s3 = sld [smem:[#allocation33_spill]]  ;;  %s2704_s14 = sld [smem:[#allocation30_spill]] }
  0x93   : > { %p2310_p8 = pnand %p1469_p6, %p2662_p2 }
  0x95   : > { %p1721_p5 = pneg %p2310_p8 }
  0x98   : > { %s2319_s4 = scalar_lea.hbm %s2703_s3, %s2168_s7  ;;  %s2705_s8 = smov %s2704_s14 }
  0x99   : > { %s1719_s13 = scalar_lea.hbm %s2704_s14, 3072 }
  0x9a   : > { %p1720_p0 = scmp.ne.s32.totalorder %s2705_s8, %s1719_s13  ;;  %p1726_p1 = scmp.lt.u32.totalorder %s1719_s13, %s2705_s8 }
  0x9c   : > { %p1722_p11 = pnand %p1721_p5, %p1720_p0 }
  0x9e   : > { %p1723_p3 = pneg %p1722_p11 }
  0xa0   : > { %p1728_p6 = pnand %p1726_p1, %p1723_p3 }
  0xa2   : > { %1731 = shalt.err (!%p1728_p6)
}
  0xa3   : > { %s1732_s0 = scalar_lea.vmem %s2304_s18, 3072  ;;  %p1740_p9 = scmp.lt.s32.totalorder %s2304_s18, %s2304_s18 }
  0xa4   : > { %p1733_p2 = scmp.ne.s32.totalorder %s2304_s18, %s1732_s0  ;;  %p1741_p4 = scmp.lt.s32.totalorder %s1732_s0, %s1732_s0 }
  0xa6   : > { %p1735_p13 = pnand %p1733_p2, %p1721_p5  ;;  %p1742_p10 = por %p1741_p4, %p1740_p9 }
  0xa8   : > { %p1736_p7 = pneg %p1735_p13 }
  0xaa   : > { %p1743_p12 = pnand %p1742_p10, %p1736_p7 }
  0xac   : > { %1746 = shalt.err (!%p1743_p12)
}
  0xad   : > { %s1975_s10 = smov 64   ;;  %s1976_s13 = smov 4  }
  0xae   : > { %1472 = dma.hbm_to_vmem [thread:$0]  (!%p2310_p8), %s2705_s8, 3072, %s2304_s18, [#allocation6], %s1975_s10, %s1975_s10, %s1976_s13  }
  0xaf   : > { %s1747_s26 = scalar_lea.hbm %s2319_s4, 512  ;;  %p2706_p13 = scmp.ne.s32.totalorder %s2694_s23, 0 }
  0xb0   : > { %p1748_p2 = scmp.ne.s32.totalorder %s2319_s4, %s1747_s26  ;;  %s1752_s20 = scalar_lea.hbm %s2703_s3, 1024 }
  0xb1   : > { %p1753_p12 = scmp.lt.u32.totalorder %s2319_s4, %s2703_s3  ;;  %p1754_p9 = scmp.lt.u32.totalorder %s1752_s20, %s1747_s26 }
  0xb2   : > { %p1750_p4 = pnand %p1748_p2, %p2706_p13  ;;  %p1756_p0 = scmp.lt.u32.totalorder %s1747_s26, %s2319_s4 }
  0xb3   : > { %p1755_p7 = por %p1754_p9, %p1753_p12 }
  0xb4   : > { %p1751_p10 = pneg %p1750_p4 }
  0xb5   : > { %p1757_p5 = por %p1756_p0, %p1755_p7 }
  0xb7   : > { %p1758_p11 = pnand %p1757_p5, %p1751_p10 }
  0xb9   : > { %1761 = shalt.err (!%p1758_p11)
}
  0xba   : > { %s1762_s18 = scalar_lea.vmem %s2321_s25, 512  ;;  %s1977_s22 = smov [#allocation9]  }
  0xbb   : > { %p1763_p8 = scmp.ne.s32.totalorder %s2321_s25, %s1762_s18  ;;  %s1767_s0 = sshll.u32 %s1977_s22, 4  ;;  %s1768_s0 = int_to_ptr.vmem [resolvable:$false] %s1767_s0 }
  0xbc   : > { %s1769_s10 = scalar_lea.vmem %s1768_s0, 1024  ;;  %p1770_p6 = scmp.lt.s32.totalorder %s2321_s25, %s1768_s0 }
  0xbd   : > { %p1765_p3 = pnand %p1763_p8, %p2706_p13  ;;  %p1771_p2 = scmp.lt.s32.totalorder %s1769_s10, %s1762_s18 }
  0xbf   : > { %p1766_p1 = pneg %p1765_p3  ;;  %p1772_p4 = por %p1771_p2, %p1770_p6 }
  0xc1   : > { %p1773_p12 = pnand %p1772_p4, %p1766_p1 }
  0xc3   : > { %1776 = shalt.err (!%p1773_p12)
}
  0xc4   : > { %p2707_p10 = scmp.ne.s32.totalorder %s2693_s5, 0  ;;  %s2708_s13 = smov 8  }
  0xc5   : > { %s2709_s14 = smov 128   ;;  %p2710_p13 = scmp.ne.s32.totalorder %s2701_s12, 0 }
  0xc6   : > { %1485 = dma.hbm_to_vmem [thread:$0]  (!%p2707_p10), %s2319_s4, 512, %s2321_s25, %s2136_s6, %s2709_s14, %s2709_s14, %s2708_s13  }
  0xc7   : > { %395 = sbr.rel (%p2710_p13) target bundleno = 806 (0x326), region = 44  ;;  %s397_s23 = sand.u32 (!%p2710_p13), 1, %s2264_s1  }
  0xc8   : > { %s2373_s17 = sand.u32 (!%p2710_p13), 1, %s1943_s9   ;;  %s398_s5 = scalar_lea.sflag (!%p2710_p13), [#allocation3], %s397_s23 }
  0xc9   : > { %s1294_s26 = sshll.u32 (!%p2710_p13), %s2373_s17, 5  ;;  %p2711_p9 = scmp.ne.s32.totalorder (!%p2710_p13), %s2696_s11, 0 }
  0xca   : > { %s401_s7 = scalar_lea.vmem (!%p2710_p13), [#allocation2], %s1294_s26 }
  0xce   : > { %1906 = dma.done.wait (%p2711_p9), %s398_s5, 512  }
  0xcf   : > { %1908 = vsyncadd (%p2711_p9), %s398_s5, 4294966784  ;;  %p2712_p7 = scmp.eq.s32.totalorder %s2264_s1, 0 }
  0xd1   : > { %1910 = dma.done.wait (%p2712_p7), [#allocation6], 3072   ;;  %p2713_p0 = pmov %p2712_p7 }
  0xd2   : > { %s412_s4 = sand.u32 1, %s1931_s28   ;;  %p2714_p5 = scmp.ne.s32.totalorder %s2697_s21, 0 }
  0xd3   : > { %1912 = vsyncadd (%p2713_p0), [#allocation6], 4294964224  ;;  %s2387_s6 = sshll.u32 %s412_s4, 5 }
  0xd4   : > { %s2390_s25 = scalar_lea.vmem [#allocation7], %s2387_s6 }
  0xd5   : > { %1914 = dma.done.wait (%p2714_p5), %s398_s5, 1536  }
  0xd6   : > { %1916 = vsyncadd (%p2714_p5), %s398_s5, 4294965760  ;;  %v2396_v0 = vld [vmem:[%s401_s7] sm:$0xff]  ;;  %v2398_v1 = vld [vmem:[%s401_s7 + $0x8] sm:$0xff]  ;;  %s2715_s12 = sld [smem:[#allocation29_spill]]  ;;  %s2420_s2 = sshll.u32 %s2373_s17, 4 }
  0xd7   : > { %v503_v2 = vmul.f32 %v2396_v0, %v2396_v0  ;;  %v2402_v3 = vld [vmem:[%s401_s7 + $0x10] sm:$0xff]  ;;  %v2404_v4 = vld [vmem:[%s401_s7 + $0x18] sm:$0xff]  ;;  %v1597_v6 = vld [vmem:[#allocation5 + $0x40] sm:$0xff]   ;;  %v504_v7 = vmul.f32 %v2398_v1, %v2398_v1  ;;  %s1978_s20 = smov 1   ;;  %s1979_s16 = smov 127  }
  0xd8   : > { %v505_v5 = vmul.f32 %v2402_v3, %v2402_v3  ;;  %v1598_v8 = vld [vmem:[#allocation5] sm:$0xff]   ;;  %v506_v9 = vmul.f32 %v2404_v4, %v2404_v4  ;;  %1401 = vmatprep.subr.bf16.mxu0 %v1597_v6  ;;  %v1599_v10 = vld [vmem:[#allocation5 + $0x48] sm:$0xff]   ;;  %v1602_v14 = vld [vmem:[#allocation5 + $0x50] sm:$0xff]   ;;  %s2425_s19 = scalar_lea.vmem [#allocation13], %s2420_s2  ;;  %s2452_s18 = scalar_lea.vmem [#allocation8], %s2387_s6 }
  0xd9   : > { %507 = vadd.xlane.f32.xlu0 %v503_v2  ;;  %1402 = vmatpush3.bf16.xpose.msra.mxu0 %v1598_v8  ;;  %v1601_v11 = vld [vmem:[#allocation5 + $0x80] sm:$0xff]   ;;  %v1600_v12 = vld [vmem:[#allocation5 + $0x8] sm:$0xff]   ;;  %v1607_v15 = vld [vmem:[#allocation5 + $0x90] sm:$0xff]   ;;  %s2459_s22 = scalar_lea.vmem [#allocation9], %s2387_s6  ;;  %s2464_s0 = scalar_lea.vmem [#allocation10], %s2420_s2 }
  0xda   : > { %511 = vadd.xlane.f32.xlu1 %v505_v5  ;;  %1403 = vmatprep.subr.bf16.mxu0 %v1599_v10  ;;  %v1604_v13 = vld [vmem:[#allocation5 + $0x88] sm:$0xff]   ;;  %v1603_v16 = vld [vmem:[#allocation5 + $0x10] sm:$0xff]   ;;  %v1605_v17 = vld [vmem:[#allocation5 + $0x58] sm:$0xff]   ;;  %s2716_s10 = sld [smem:[#allocation20_spill]]  ;;  %s2717_s13 = sld [smem:[#allocation21_spill]] }
  0xdb   : > { %1431 = vmatprep.subr.bf16.mxu1 %v1601_v11  ;;  %v1610_v18 = vld [vmem:[#allocation5 + $0x98] sm:$0xff]   ;;  %v1608_v20 = vld [vmem:[#allocation5 + $0x60] sm:$0xff]   ;;  %v1611_v23 = vld [vmem:[#allocation5 + $0x68] sm:$0xff]   ;;  %s2472_s14 = scalar_lea.vmem [#allocation11], %s2420_s2  ;;  %s1012_s4 = sshll.u32 %s2464_s0, 4  ;;  %s2484_s4 = int_to_ptr.vmem [resolvable:$true] %s1012_s4 }
  0xdc   : > { %1432 = vmatpush3.bf16.xpose.msra.mxu1 %v1601_v11  ;;  %v1606_v19 = vld [vmem:[#allocation5 + $0x18] sm:$0xff]   ;;  %v1613_v21 = vld [vmem:[#allocation5 + $0xa0] sm:$0xff]   ;;  %v1616_v24 = vld [vmem:[#allocation5 + $0xa8] sm:$0xff]   ;;  %s2718_s21 = sld [smem:[#allocation34_spill]]  ;;  %s1030_s2 = sshll.u32 %s2472_s14, 4  ;;  %s2526_s2 = int_to_ptr.vmem [resolvable:$true] %s1030_s2 }
  0xdd   : > { %509 = vadd.xlane.f32.xlu0 %v504_v7  ;;  %1433 = vmatprep.subr.bf16.mxu1 %v1604_v13  ;;  %v1609_v22 = vld [vmem:[#allocation5 + $0x20] sm:$0xff]   ;;  %v1612_v25 = vld [vmem:[#allocation5 + $0x28] sm:$0xff]   ;;  %v1614_v26 = vld [vmem:[#allocation5 + $0x70] sm:$0xff]   ;;  %p2719_p8 = scmp.ne.s32.totalorder %s2699_s24, 0 }
  0xde   : > { %513 = vadd.xlane.f32.xlu1 %v506_v9  ;;  %v1619_v27 = vld [vmem:[#allocation5 + $0xb0] sm:$0xff]   ;;  %v1617_v29 = vld [vmem:[#allocation5 + $0x78] sm:$0xff]   ;;  %v1302_v44 = vld [vmem:[%s2715_s12] ss:$0 sm:$0xff] }
  0xdf   : > { %v1615_v28 = vld [vmem:[#allocation5 + $0x30] sm:$0xff]   ;;  %v1620_v30 = vld [vmem:[#allocation5 + $0xb8] sm:$0xff]   ;;  %v528_v45 = vmul.f32 %v1302_v44, %v2402_v3  ;;  %v526_v47 = vmul.f32 %v1302_v44, %v2396_v0  ;;  %v527_v48 = vmul.f32 %v1302_v44, %v2398_v1  ;;  %v529_v50 = vmul.f32 %v1302_v44, %v2404_v4  ;;  %v842_v9 = vld [vmem:[%s2452_s18] sm:$0xff] }
  0xe0   : > { %v1618_v31 = vld [vmem:[#allocation5 + $0x38] sm:$0xff]   ;;  %v838_v10 = vld [vmem:[%s2390_s25] sm:$0xff]  ;;  %v844_v44 = vld [vmem:[%s2452_s18 + $0x10] sm:$0xff]  ;;  %s1342_s26 = sshll.u32 %s2716_s10, 2  ;;  %s1343_s5 = sshll.u32 %s2717_s13, 3 }
  0xe1   : > { %1404 = vmatpush3.bf16.xpose.msra.mxu0 %v1600_v12  ;;  %v843_v12 = vld [vmem:[%s2452_s18 + $0x8] sm:$0xff]  ;;  %s1009_s7 = sadd.s32 %s1343_s5, %s1342_s26 }
  0xe2   : > { %1405 = vmatprep.subr.bf16.mxu0 %v1602_v14  ;;  %v839_v14 = vld [vmem:[%s2390_s25 + $0x8] sm:$0xff]  ;;  %s2482_s6 = sshll.u32 %s1009_s7, 6 }
  0xe3   : > { %s2492_s12 = scalar_lea.hbm %s2718_s21, %s2482_s6 }
  0xe4   : > { %1434 = vmatpush3.bf16.xpose.msra.mxu1 %v1604_v13 }
  0xe5   : > { %1435 = vmatprep.subr.bf16.mxu1 %v1607_v15 }
  0xe9   : > { %1406 = vmatpush3.bf16.xpose.msra.mxu0 %v1603_v16  ;;  %v846_v16 = vld [vmem:[%s2459_s22] sm:$0xff] }
  0xea   : > { %1407 = vmatprep.subr.bf16.mxu0 %v1605_v17 }
  0xec   : > { %1436 = vmatpush3.bf16.xpose.msra.mxu1 %v1607_v15 }
  0xed   : > { %1437 = vmatprep.subr.bf16.mxu1 %v1610_v18 }
  0xf1   : > { %1408 = vmatpush3.bf16.xpose.msra.mxu0 %v1606_v19 }
  0xf2   : > { %1409 = vmatprep.subr.bf16.mxu0 %v1608_v20  ;;  %v847_v20 = vld [vmem:[%s2459_s22 + $0x8] sm:$0xff] }
  0xf4   : > { %1438 = vmatpush3.bf16.xpose.msra.mxu1 %v1610_v18 }
  0xf5   : > { %1439 = vmatprep.subr.bf16.mxu1 %v1613_v21 }
  0xf9   : > { %1410 = vmatpush3.bf16.xpose.msra.mxu0 %v1609_v22 }
  0xfa   : > { %1411 = vmatprep.subr.bf16.mxu0 %v1611_v23 }
  0xfc   : > { %1440 = vmatpush3.bf16.xpose.msra.mxu1 %v1613_v21 }
  0xfd   : > { %1441 = vmatprep.subr.bf16.mxu1 %v1616_v24 }
 0x101   : > { %1412 = vmatpush3.bf16.xpose.msra.mxu0 %v1612_v25 }
 0x102   : > { %1413 = vmatprep.subr.bf16.mxu0 %v1614_v26 }
 0x104   : > { %1442 = vmatpush3.bf16.xpose.msra.mxu1 %v1616_v24 }
 0x105   : > { %1443 = vmatprep.subr.bf16.mxu1 %v1619_v27 }
 0x109   : > { %1414 = vmatpush3.bf16.xpose.msra.mxu0 %v1615_v28 }
 0x10a   : > { %1415 = vmatprep.subr.bf16.mxu0 %v1617_v29 }
 0x10c   : > { %1444 = vmatpush3.bf16.xpose.msra.mxu1 %v1619_v27 }
 0x10d   : > { %1445 = vmatprep.subr.bf16.mxu1 %v1620_v30 }
 0x111   : > { %1416 = vmatpush3.bf16.xpose.msra.mxu0 %v1618_v31 }
 0x114   : > { %1446 = vmatpush3.bf16.xpose.msra.mxu1 %v1620_v30 }
 0x166   : > { %v508_v32 = vpop.xlane.xlu0 %507 }
 0x167   : > { %v516_v33 = vmul.f32 0.0078125, %v508_v32  ;;  %v512_v34 = vpop.xlane.xlu1 %511 }
 0x168   : > { %v518_v35 = vmul.f32 0.0078125, %v512_v34 }
 0x169   : > { %v530_v36 = vadd.f32 1e-05, %v516_v33 }
 0x16a   : > { %v510_v37 = vpop.xlane.xlu0 %509  ;;  %v532_v38 = vadd.f32 1e-05, %v518_v35 }
 0x16b   : > { %v517_v39 = vmul.f32 0.0078125, %v510_v37  ;;  %v514_v40 = vpop.xlane.xlu1 %513 }
 0x16c   : > { %1621 = vrsqrt.f32 %v532_v38  ;;  %v519_v41 = vmul.f32 0.0078125, %v514_v40 }
 0x16d   : > { %1623 = vrsqrt.f32 %v530_v36  ;;  %v531_v42 = vadd.f32 1e-05, %v517_v39 }
 0x16e   : > { %v533_v43 = vadd.f32 1e-05, %v519_v41 }
 0x16f   : > { %1625 = vrsqrt.f32 %v531_v42 }
 0x170   : > { %1627 = vrsqrt.f32 %v533_v43 }
 0x176   : > { %v1622_v46 = vpop.eup %1621 }
 0x177   : > { %v1624_v49 = vpop.eup %1623  ;;  %v540_v52 = vmul.f32 %v1622_v46, %v528_v45 }
 0x178   : > { %v538_v54 = vmul.f32 %v1624_v49, %v526_v47  ;;  %v840_v47 = vld [vmem:[%s2390_s25 + $0x10] sm:$0xff] }
 0x179   : > { %v1626_v51 = vpop.eup %1625 }
 0x17a   : > { %v1628_v53 = vpop.eup %1627  ;;  %v539_v55 = vmul.f32 %v1626_v51, %v527_v48 }
 0x17b   : > { %v541_v56 = vmul.f32 %v1628_v53, %v529_v50 }
 0x17c   : > { %v542_v57 = vpack.c.bf16 %v539_v55, %v538_v54  ;;  %v841_v54 = vld [vmem:[%s2390_s25 + $0x18] sm:$0xff]  ;;  %v848_v55 = vld [vmem:[%s2459_s22 + $0x10] sm:$0xff] }
 0x17d   : > { %v543_v58 = vpack.c.bf16 %v541_v56, %v540_v52  ;;  %v845_v52 = vld [vmem:[%s2452_s18 + $0x18] sm:$0xff]  ;;  %s1980_s18 = smov [#allocation10]  }
 0x17e   : > { %1417 = vmatprep.mubr.bf16.mxu0 %v542_v57  ;;  %1447 = vmatprep.mubr.bf16.mxu1 %v542_v57 }
 0x17f   : > { %1418 = vmatmul.mubr.bf16.vlgmr.msra.gmra.mrb[0].mxu0 %v542_v57  ;;  %1448 = vmatmul.mubr.bf16.vlgmr.msra.gmra.mrb[0].mxu1 %v543_v58 }
 0x180   : > { %1419 = vmatprep.mubr.bf16.mxu0 %v543_v58 }
 0x187   : > { %1420 = vmatmul.mubr.bf16.gmra.mrb[4].mxu0 %v543_v58 }
 0x252   : > { %v770_v59 = vpop.f32.mrb[0].mxu0  ;;  %v1449_v60 = vpop.f32.mrb[0].mxu1 }
 0x253   : > { %854 = vrot.lane.b32.xlu0 %v770_v59, %s1978_s20  ;;  %v772_v61 = vpop.f32.mrb[1].mxu0  ;;  %v823_v62 = vpop.f32.mrb[1].mxu1  ;;  %v850_v17 = vmul.f32 %v838_v10, %v770_v59 }
 0x254   : > { %v774_v63 = vpop.f32.mrb[2].mxu0  ;;  %v1450_v0 = vpop.f32.mrb[2].mxu1  ;;  %v910_v36 = vmul.f32 %v838_v10, %v772_v61 }
 0x255   : > { %856 = vrot.lane.b32.xlu1 %v774_v63, %s1978_s20  ;;  %v776_v1 = vpop.f32.mrb[3].mxu0  ;;  %v1396_v2 = vpack.c.bf16 %v1450_v0, %v1449_v60  ;;  %v826_v3 = vpop.f32.mrb[3].mxu1  ;;  %v851_v21 = vmul.f32 %v839_v14, %v774_v63  ;;  %v849_v60 = vld [vmem:[%s2459_s22 + $0x18] sm:$0xff]  ;;  %s1781_s22 = sshll.u32 %s1980_s18, 4  ;;  %s1782_s22 = int_to_ptr.vmem [resolvable:$false] %s1781_s22 }
 0x256   : > { %v1391_v4 = vpack.c.bf16 %v826_v3, %v823_v62  ;;  %v911_v37 = vmul.f32 %v839_v14, %v776_v1  ;;  %s1783_s10 = scalar_lea.vmem %s1782_s22, 512  ;;  %p1784_p6 = scmp.lt.s32.totalorder %s2484_s4, %s1782_s22 }
 0x257   : > { %870 = vrot.lane.b32.xlu0 %v770_v59, %s1979_s16  ;;  %1400 = vst [vmem:[%s2425_s19 + $0x8] sm:$0xff] %v1396_v2  }
 0x258   : > { %1392 = vst [vmem:[%s2425_s19] sm:$0xff] %v1391_v4  }
 0x259   : > { %872 = vrot.lane.b32.xlu1 %v774_v63, %s1979_s16 }
 0x25a   : > { %v2429_v5 = vpop.f32.mrb[4].mxu0 }
 0x25b   : > { %914 = vrot.lane.b32.xlu0 %v772_v61, %s1978_s20  ;;  %v2432_v6 = vpop.f32.mrb[5].mxu0  ;;  %v852_v53 = vmul.f32 %v840_v47, %v2429_v5 }
 0x25c   : > { %v2434_v7 = vpop.f32.mrb[6].mxu0 }
 0x25d   : > { %916 = vrot.lane.b32.xlu1 %v776_v1, %s1978_s20  ;;  %v2437_v8 = vpop.f32.mrb[7].mxu0 }
 0x25f   : > { %930 = vrot.lane.b32.xlu0 %v772_v61, %s1979_s16  ;;  %v853_v61 = vmul.f32 %v841_v54, %v2434_v7 }
 0x261   : > { %932 = vrot.lane.b32.xlu1 %v776_v1, %s1979_s16 }
 0x263   : > { %874 = vrot.lane.b32.xlu0 %v2429_v5, %s1979_s16 }
 0x265   : > { %858 = vrot.lane.b32.xlu1 %v2429_v5, %s1978_s20 }
 0x267   : > { %918 = vrot.lane.b32.xlu0 %v2432_v6, %s1978_s20 }
 0x269   : > { %860 = vrot.lane.b32.xlu1 %v2434_v7, %s1978_s20 }
 0x26b   : > { %934 = vrot.lane.b32.xlu0 %v2432_v6, %s1979_s16 }
 0x26d   : > { %876 = vrot.lane.b32.xlu1 %v2434_v7, %s1979_s16 }
 0x271   : > { %920 = vrot.lane.b32.xlu1 %v2437_v8, %s1978_s20  ;;  %s987_s20 = scalar_lea.sflag [#allocation4], %s2373_s17 }
 0x275   : > { %936 = vrot.lane.b32.xlu1 %v2437_v8, %s1979_s16  ;;  %s1777_s16 = scalar_lea.vmem %s2484_s4, 256 }
 0x276   : > { %p1778_p11 = scmp.ne.s32.totalorder %s2484_s4, %s1777_s16  ;;  %p1785_p2 = scmp.lt.s32.totalorder %s1783_s10, %s1777_s16 }
 0x278   : > { %p1779_p3 = pnand %p1778_p11, %p2719_p8  ;;  %p1786_p4 = por %p1785_p2, %p1784_p6 }
 0x27a   : > { %p1780_p1 = pneg %p1779_p3 }
 0x27c   : > { %p1787_p12 = pnand %p1786_p4, %p1780_p1 }
 0x2c5   : > { %v855_v11 = vpop.permute.xlu0 %854 }
 0x2c6   : > { %v862_v13 = vmul.f32 %v855_v11, %v842_v9 }
 0x2c7   : > { %v857_v15 = vpop.permute.xlu1 %856 }
 0x2c8   : > { %v863_v18 = vmul.f32 %v857_v15, %v843_v12  ;;  %v866_v22 = vadd.f32 %v862_v13, %v850_v17  ;;  %v913_v13 = vmul.f32 %v841_v54, %v2437_v8 }
 0x2c9   : > { %v871_v19 = vpop.permute.xlu0 %870 }
 0x2ca   : > { %v878_v23 = vmul.f32 %v871_v19, %v846_v16  ;;  %v867_v25 = vadd.f32 %v863_v18, %v851_v21 }
 0x2cb   : > { %v873_v24 = vpop.permute.xlu1 %872 }
 0x2cc   : > { %v882_v26 = vsub.f32 %v866_v22, %v878_v23  ;;  %v879_v27 = vmul.f32 %v873_v24, %v847_v20 }
 0x2cd   : > { %v915_v28 = vpop.permute.xlu0 %914 }
 0x2ce   : > { %v883_v29 = vsub.f32 %v867_v25, %v879_v27  ;;  %v886_v31 = vmul.f32 0.17677669, %v882_v26  ;;  %v922_v33 = vmul.f32 %v915_v28, %v842_v9 }
 0x2cf   : > { %v917_v30 = vpop.permute.xlu1 %916 }
 0x2d0   : > { %v887_v32 = vmul.f32 0.17677669, %v883_v29  ;;  %v923_v34 = vmul.f32 %v917_v30, %v843_v12  ;;  %v926_v41 = vadd.f32 %v922_v33, %v910_v36  ;;  %v912_v12 = vmul.f32 %v840_v47, %v2432_v6 }
 0x2d1   : > { %v931_v35 = vpop.permute.xlu0 %930 }
 0x2d2   : > { %v1371_v38 = vpack.c.bf16 %v887_v32, %v886_v31  ;;  %v938_v39 = vmul.f32 %v931_v35, %v846_v16  ;;  %v927_v42 = vadd.f32 %v923_v34, %v911_v37 }
 0x2d3   : > { %v933_v40 = vpop.permute.xlu1 %932 }
 0x2d4   : > { %1372 = vst [vmem:[%s2464_s0] sm:$0xff] %v1371_v38   ;;  %v939_v43 = vmul.f32 %v933_v40, %v847_v20  ;;  %v942_v45 = vsub.f32 %v926_v41, %v938_v39 }
 0x2d5   : > { %v875_v48 = vpop.permute.xlu0 %874 }
 0x2d6   : > { %v943_v46 = vsub.f32 %v927_v42, %v939_v43  ;;  %v880_v62 = vmul.f32 %v875_v48, %v848_v55 }
 0x2d7   : > { %v859_v49 = vpop.permute.xlu1 %858 }
 0x2d8   : > { %v1381_v50 = vpack.c.bf16 %v943_v46, %v942_v45  ;;  %v864_v51 = vmul.f32 %v859_v49, %v844_v44 }
 0x2d9   : > { %v919_v59 = vpop.permute.xlu0 %918 }
 0x2da   : > { %1382 = vst [vmem:[%s2472_s14] sm:$0xff] %v1381_v50   ;;  %v868_v57 = vadd.f32 %v864_v51, %v852_v53  ;;  %v924_v7 = vmul.f32 %v919_v59, %v844_v44 }
 0x2db   : > { %v861_v56 = vpop.permute.xlu1 %860 }
 0x2dc   : > { %v865_v58 = vmul.f32 %v861_v56, %v845_v52  ;;  %v884_v0 = vsub.f32 %v868_v57, %v880_v62  ;;  %v928_v17 = vadd.f32 %v924_v7, %v912_v12 }
 0x2dd   : > { %v935_v4 = vpop.permute.xlu0 %934 }
 0x2de   : > { %v869_v1 = vadd.f32 %v865_v58, %v853_v61  ;;  %v888_v9 = vmul.f32 0.17677669, %v884_v0  ;;  %v940_v14 = vmul.f32 %v935_v4, %v848_v55 }
 0x2df   : > { %v877_v63 = vpop.permute.xlu1 %876 }
 0x2e0   : > { %v881_v2 = vmul.f32 %v877_v63, %v849_v60 }
 0x2e2   : > { %v885_v3 = vsub.f32 %v869_v1, %v881_v2 }
 0x2e3   : > { %v921_v5 = vpop.permute.xlu1 %920 }
 0x2e4   : > { %v889_v10 = vmul.f32 0.17677669, %v885_v3  ;;  %v925_v11 = vmul.f32 %v921_v5, %v845_v52 }
 0x2e6   : > { %v1376_v15 = vpack.c.bf16 %v889_v10, %v888_v9  ;;  %v929_v18 = vadd.f32 %v925_v11, %v913_v13 }
 0x2e7   : > { %v937_v16 = vpop.permute.xlu1 %936 }
 0x2e8   : > { %1398 = vst [vmem:[%s2464_s0 + $0x8] sm:$0xff] %v1376_v15   ;;  %v941_v19 = vmul.f32 %v937_v16, %v849_v60 }
 0x2e9   : > { %1790 = shalt.err (!%p1787_p12)
}
 0x2ea   : > { %s1791_s0 = scalar_lea.hbm %s2492_s12, 256  ;;  %s1795_s5 = scalar_lea.hbm %s2718_s21, 1024 }
 0x2eb   : > { %p1792_p10 = scmp.ne.s32.totalorder %s2492_s12, %s1791_s0  ;;  %p1796_p7 = scmp.lt.u32.totalorder %s2492_s12, %s2718_s21 }
 0x2ec   : > { %p1797_p0 = scmp.lt.u32.totalorder %s1795_s5, %s1791_s0  ;;  %p1799_p11 = scmp.lt.u32.totalorder %s1791_s0, %s2492_s12 }
 0x2ed   : > { %p1793_p13 = pnand %p1792_p10, %p2719_p8 }
 0x2ee   : > { %p1798_p5 = por %p1797_p0, %p1796_p7 }
 0x2ef   : > { %p1794_p9 = pneg %p1793_p13 }
 0x2f0   : > { %p1800_p3 = por %p1799_p11, %p1798_p5 }
 0x2f2   : > { %p1801_p1 = pnand %p1800_p3, %p1794_p9 }
 0x2f4   : > { %1804 = shalt.err (!%p1801_p1)
}
 0x2f5   : > { %s1981_s11 = smov 64   ;;  %s1982_s16 = smov 4   ;;  %v944_v6 = vsub.f32 %v928_v17, %v940_v14  ;;  %v945_v8 = vsub.f32 %v929_v18, %v941_v19 }
 0x2f6   : > { %1463 = dma.vmem_to_hbm [thread:$0]  (%p2719_p8), %s2484_s4, 256, %s2492_s12, %s987_s20, %s1981_s11, %s1981_s11, %s1982_s16  }
 0x2f7   : > { %s1048_s18 = sshll.u32 %s2425_s19, 4  ;;  %v1386_v20 = vpack.c.bf16 %v945_v8, %v944_v6  ;;  %s2720_s0 = sld [smem:[#allocation35_spill]]  ;;  %s2534_s18 = int_to_ptr.vmem [resolvable:$true] %s1048_s18 }
 0x2f8   : > { %s2721_s4 = sld [smem:[#allocation36_spill]]  ;;  %s2545_s12 = scalar_lea.sflag [#allocation12], %s397_s23 }
 0x2f9   : > { %1399 = vst [vmem:[%s2472_s14 + $0x8] sm:$0xff] %v1386_v20   ;;  %s1805_s20 = scalar_lea.vmem %s2526_s2, 256  ;;  %s1983_s5 = smov [#allocation11]  }
 0x2fa   : > { %p1806_p6 = scmp.ne.s32.totalorder %s2526_s2, %s1805_s20  ;;  %s1809_s7 = sshll.u32 %s1983_s5, 4  ;;  %s1810_s7 = int_to_ptr.vmem [resolvable:$false] %s1809_s7 }
 0x2fb   : > { %s1811_s25 = scalar_lea.vmem %s1810_s7, 512  ;;  %p1812_p12 = scmp.lt.s32.totalorder %s2526_s2, %s1810_s7 }
 0x2fc   : > { %p1807_p2 = pnand %p1806_p6, %p2719_p8  ;;  %p1813_p10 = scmp.lt.s32.totalorder %s1811_s25, %s1805_s20 }
 0x2fd   : > { %s2532_s13 = scalar_lea.hbm %s2720_s0, %s2482_s6 }
 0x2fe   : > { %s2540_s19 = scalar_lea.hbm %s2721_s4, %s2482_s6  ;;  %p1808_p4 = pneg %p1807_p2 }
 0x2ff   : > { %p1814_p13 = por %p1813_p10, %p1812_p12 }
 0x301   : > { %p1815_p9 = pnand %p1814_p13, %p1808_p4 }
 0x303   : > { %1818 = shalt.err (!%p1815_p9)
}
 0x304   : > { %s1819_s1 = scalar_lea.hbm %s2532_s13, 256  ;;  %s1823_s6 = scalar_lea.hbm %s2720_s0, 1024 }
 0x305   : > { %p1820_p7 = scmp.ne.s32.totalorder %s2532_s13, %s1819_s1  ;;  %p1824_p11 = scmp.lt.u32.totalorder %s2532_s13, %s2720_s0 }
 0x306   : > { %p1825_p3 = scmp.lt.u32.totalorder %s1823_s6, %s1819_s1  ;;  %p1827_p6 = scmp.lt.u32.totalorder %s1819_s1, %s2532_s13 }
 0x307   : > { %p1821_p0 = pnand %p1820_p7, %p2719_p8 }
 0x308   : > { %p1826_p1 = por %p1825_p3, %p1824_p11 }
 0x309   : > { %p1822_p5 = pneg %p1821_p0 }
 0x30a   : > { %p1828_p2 = por %p1827_p6, %p1826_p1 }
 0x30c   : > { %p1829_p4 = pnand %p1828_p2, %p1822_p5 }
 0x30e   : > { %1832 = shalt.err (!%p1829_p4)
}
 0x30f   : > { %1464 = dma.vmem_to_hbm [thread:$0]  (%p2719_p8), %s2526_s2, 256, %s2532_s13, %s2545_s12, %s1981_s11, %s1981_s11, %s1982_s16  }
 0x310   : > { %s1833_s26 = scalar_lea.vmem %s2534_s18, 256  ;;  %s1984_s17 = smov [#allocation13]  }
 0x311   : > { %p1834_p12 = scmp.ne.s32.totalorder %s2534_s18, %s1833_s26  ;;  %s1837_s20 = sshll.u32 %s1984_s17, 4  ;;  %s1838_s20 = int_to_ptr.vmem [resolvable:$false] %s1837_s20 }
 0x312   : > { %s1839_s5 = scalar_lea.vmem %s1838_s20, 512  ;;  %p1840_p9 = scmp.lt.s32.totalorder %s2534_s18, %s1838_s20 }
 0x313   : > { %p1835_p10 = pnand %p1834_p12, %p2719_p8  ;;  %p1841_p7 = scmp.lt.s32.totalorder %s1839_s5, %s1833_s26 }
 0x315   : > { %p1836_p13 = pneg %p1835_p10  ;;  %p1842_p0 = por %p1841_p7, %p1840_p9 }
 0x317   : > { %p1843_p5 = pnand %p1842_p0, %p1836_p13 }
 0x319   : > { %1846 = shalt.err (!%p1843_p5)
}
 0x31a   : > { %s1847_s2 = scalar_lea.hbm %s2540_s19, 256  ;;  %s1851_s25 = scalar_lea.hbm %s2721_s4, 1024 }
 0x31b   : > { %p1848_p11 = scmp.ne.s32.totalorder %s2540_s19, %s1847_s2  ;;  %p1852_p6 = scmp.lt.u32.totalorder %s2540_s19, %s2721_s4 }
 0x31c   : > { %p1853_p2 = scmp.lt.u32.totalorder %s1851_s25, %s1847_s2  ;;  %p1855_p12 = scmp.lt.u32.totalorder %s1847_s2, %s2540_s19 }
 0x31d   : > { %p1849_p3 = pnand %p1848_p11, %p2719_p8 }
 0x31e   : > { %p1854_p4 = por %p1853_p2, %p1852_p6 }
 0x31f   : > { %p1850_p1 = pneg %p1849_p3 }
 0x320   : > { %p1856_p10 = por %p1855_p12, %p1854_p4 }
 0x322   : > { %p1857_p13 = pnand %p1856_p10, %p1850_p1 }
 0x324   : > { %1860 = shalt.err (!%p1857_p13)
}
 0x325   : > { %1465 = dma.vmem_to_hbm [thread:$0]  (%p2719_p8), %s2534_s18, 256, %s2540_s19, %s2545_s12, %s1981_s11, %s1981_s11, %s1982_s16  }
 0x326 PF: > { %p1499_p9 = scmp.ge.s32.totalorder %s1967_s15, 2  ;;  %s1063_s14 = sand.u32 1, %s1939_s30  }
 0x327   : > { %p2722_p7 = scmp.ne.s32.totalorder %s2700_s27, 0  ;;  %s1064_s6 = scalar_lea.sflag [#allocation4], %s1063_s14 }
 0x329   : > { %p1487_p0 = pnand %p1499_p9, %p2722_p7 }
 0x32b   : > { %1918 = dma.done.wait (!%p1487_p0), %s1064_s6, 256  }
 0x32c   : > { %1920 = vsyncadd (!%p1487_p0), %s1064_s6, 4294967040  ;;  %s2723_s24 = sadd.s32 4294967294, %s1967_s15  }
 0x32d   : > { %s1072_s22 = sand.u32 1, %s2723_s24  }
 0x32e   : > { %s1073_s10 = scalar_lea.sflag [#allocation12], %s1072_s22 }
 0x32f   : > { %1922 = dma.done.wait (!%p1487_p0), %s1073_s10, 512  }
 0x330   : > { %1924 = vsyncadd (!%p1487_p0), %s1073_s10, 4294966784  ;;  %s29_s15 = sadd.s32 1, %s1967_s15   ;;  %s2724_s11 = sld [smem:[#allocation27_spill]] }
 0x331   : > { %p26_p8 = scmp.ge.s32.totalorder %s29_s15, 6   ;;  %s2725_s16 = sld [smem:[#allocation19_spill]] }
 0x332   : > { %s2726_s10 = sld [smem:[#allocation26_spill]]  ;;  %s2727_s18 = sld [smem:[#allocation22_spill]] }
 0x333   : > { %s2728_s12 = sld [smem:[#allocation23_spill]]  ;;  %s2729_s13 = sld [smem:[#allocation24_spill]] }
 0x334   : > { %s2730_s14 = sld [smem:[#allocation25_spill]]  ;;  %s2731_s27 = smov %s1931_s28 }
 0x335   : > { %s2732_s28 = smov %s1935_s29  ;;  %s2734_s30 = smov %s1943_s9 }
 0x336   : > { %s2733_s29 = smov %s2724_s11  ;;  %28 = sbr.rel (!%p26_p8) target bundleno = 22 (0x16), region = 158 }
 0x337   : > { %s2735_s9 = smov %s2725_s16 }
 0x338   : > { %s2736_s11 = smov %s2727_s18 }
 0x33d   :  { %1087 = vsyncpa [#allocation3], 1 }
 0x33e   :  { %1089 = vsyncpa [#allocation3 + $0x1], 1 }
 0x33f   :  { %1090 = vsyncpa [#allocation6], 1 }
 0x340   :  { %1091 = vsyncpa [#allocation4], 1 }
 0x341   :  { %1093 = vsyncpa [#allocation4 + $0x1], 1 }
 0x342   :  { %1094 = vsyncpa [#allocation12], 1 }
 0x343   :  { %1096 = vsyncpa [#allocation12 + $0x1], 1 }

</bundles_post_ra>
